<compile_context>
chip_gen: v7x
topology: tpu7x:2x2x1
jax: 0.10.0
libtpu: 0.0.40
codegen_flags: <defaults>
</compile_context>

<pallas_src>
import jax
import jax.numpy as jnp
import numpy as np
from jax import lax
from jax.experimental import pallas as pl
from jax.experimental.pallas import tpu as pltpu

_K = 32.0
# (dy, dx) offsets of the target relative to the input, derived from the
# original (L, R, T, B) shift tuples and their "opposite" target paddings.
# Index 0 is the center (no shift).
_SHIFTS = ((0, 0), (1, 0), (-1, 0), (0, 1), (0, -1),
           (1, 1), (-1, -1), (1, -1), (-1, 1))


def _row_shift(t, dy):
    """result[..., r, :] = t[..., r+dy, :], zero outside (sublane axis)."""
    if dy == 0:
        return t
    z = jnp.zeros_like(t[..., :1, :])
    if dy == 1:
        return jnp.concatenate([t[..., 1:, :], z], axis=-2)
    return jnp.concatenate([z, t[..., :-1, :]], axis=-2)


def _col_shift(t, dx):
    """result[..., :, c] = t[..., :, c+dx], zero outside (lane axis)."""
    if dx == 0:
        return t
    z = jnp.zeros_like(t[..., :, :1])
    if dx == 1:
        return jnp.concatenate([t[..., :, 1:], z], axis=-1)
    return jnp.concatenate([z, t[..., :, :-1]], axis=-1)


def _shift(t, dy, dx):
    return _col_shift(_row_shift(t, dy), dx)


def _jitter_loss_kernel(length_ref, x_ref, t_ref, out_ref, diff_ref):
    """One grid step == `bt` batch elements.

    length_ref : SMEM (B,) int32          scalar-prefetched sequence lengths
    x_ref      : VMEM (bt, T, D)          input slab for these batch elements
    t_ref      : VMEM (bt, T, D)          target slab (same HBM dtype as input)
    out_ref    : VMEM (bt, 1, 128) f32    per-batch masked partial sums
    diff_ref   : VMEM (9, bt, T, D) f32   scratch cache of the 9 shifted diffs
    """
    bt, T, D = x_ref.shape
    x = x_ref[...].astype(jnp.float32)
    t = t_ref[...].astype(jnp.float32)

    # Pass 1: each shifted diff is computed exactly once, cached in the VMEM
    # scratch slab (ld/st slots have slack; VALU is the binding unit) and
    # folded into the running minimum.  No row-shifted targets kept live.
    m = None
    for s, (dy, dx) in enumerate(_SHIFTS):
        d = jnp.abs(x - _shift(t, dy, dx))
        diff_ref[s] = d
        m = d if s == 0 else jnp.minimum(m, d)

    # Pass 2: stabilized smooth minimum over the cached diffs.  Subtracting m
    # keeps every exponent <= 0 (no underflow -> no log(0)) and is
    # mathematically identical to smin = -log(sum_i exp(-K d_i)) / K.
    exp_sum = jnp.exp(-_K * (diff_ref[0] - m))
    for s in range(1, len(_SHIFTS)):
        exp_sum = exp_sum + jnp.exp(-_K * (diff_ref[s] - m))
    smin = m - jnp.log(exp_sum) * (1.0 / _K)

    jittered = 0.5 * (diff_ref[0] + smin)          # "center_and_min_avg"

    # Vectorized epilogue: one lane-axis reduction over the whole tile, then
    # cheap per-batch (T, 1) masking and sublane reduction.
    partial = jnp.sum(jittered, axis=-1, keepdims=True)          # (bt, T, 1)
    row = lax.broadcasted_iota(jnp.int32, (T, 1), 0)
    zeros_row = jnp.zeros((1, 128), jnp.float32)                 # hoisted
    b0 = pl.program_id(0)
    for j in range(bt):
        seq_len = length_ref[b0 * bt + j]
        mask = (row < seq_len).astype(jnp.float32)               # (T, 1)
        total = jnp.sum(partial[j] * mask)                       # scalar
        out_ref[j, :, :] = zeros_row + total


def _hw_vmem_bytes():
    """Physical VMEM per TensorCore; conservative fallback off-TPU."""
    try:
        return int(pltpu.get_tpu_info().vmem_capacity_bytes)
    except Exception:            # non-TPU backend / interpret mode / old jax
        return 64 << 20          # v7x per-TC size (the smallest generation)


def _default_batch_tile(B, T, D, cap_bytes):
    """Largest divisor-of-B batch fold whose f32 tile fits `cap_bytes`, while
    keeping >= 2 grid steps when possible (megacore / v7x 2-TC split)."""
    per_elem_bytes = T * D * 4
    best = 1
    for cand in range(1, B + 1):
        if B % cand:
            continue
        if cand * per_elem_bytes > cap_bytes:
            continue
        if B // cand < 2 and B > 1:        # keep the batch grid splittable
            continue
        best = cand
    return best


def jitter_loss(inp, target, length, masked=True, batch_tile=None):
    """Pallas implementation of JitterLoss.forward(input, target, length)."""
    B, T, D = inp.shape
    if not masked:
        length = jnp.full((B,), T, dtype=jnp.int32)

    phys_vmem = _hw_vmem_bytes()
    # ~1 MiB f32 input tiles on v5e/v6e (128 MiB VMEM), ~512 KiB on v7x (64 MiB).
    cap_bytes = min(1 << 20, phys_vmem // 128)
    bt = _default_batch_tile(B, T, D, cap_bytes) if batch_tile is None else batch_tile
    assert B % bt == 0, (B, bt)

    tile_elems = bt * T * D
    in_bytes = inp.dtype.itemsize
    # 2 inputs x 2 pipeline buffers + 9-slab f32 diff cache + ~4 tiles of f32
    # working values / regalloc spill slack; 2x headroom, clamped under the
    # physical VMEM of the smallest generation in use.
    need = tile_elems * (4 * in_bytes + (9 + 4) * 4)
    vmem_limit = int(min(max(2 * need, 32 << 20), phys_vmem - (8 << 20)))

    n_elem = B * T * D
    cost = pl.CostEstimate(
        flops=64 * n_elem,                      # 9 diffs + min + lse + average
        transcendentals=10 * n_elem,            # 9 exp + 1 log per element
        bytes_accessed=int(2 * n_elem * in_bytes + B * 128 * 4),
    )

    per_batch = pl.pallas_call(
        _jitter_loss_kernel,
        out_shape=jax.ShapeDtypeStruct((B, 1, 128), jnp.float32),
        grid_spec=pltpu.PrefetchScalarGridSpec(
            num_scalar_prefetch=1,
            grid=(B // bt,),
            in_specs=[
                pl.BlockSpec((bt, T, D), lambda i, lens: (i, 0, 0)),
                pl.BlockSpec((bt, T, D), lambda i, lens: (i, 0, 0)),
            ],
            out_specs=pl.BlockSpec((bt, 1, 128), lambda i, lens: (i, 0, 0)),
            scratch_shapes=[pltpu.VMEM((len(_SHIFTS), bt, T, D), jnp.float32)],
        ),
        compiler_params=pltpu.CompilerParams(
            dimension_semantics=("parallel",),
            vmem_limit_bytes=vmem_limit),
        cost_estimate=cost,
    )(length.astype(jnp.int32), inp, target)

    # Final mean over all elements (masked zeros included in the denominator),
    # matching torch.mean(jittered).
    return jnp.sum(per_batch[:, 0, 0]) / (B * T * D)


def _jitter_loss_ref(inp, target, length, masked=True):
    """Pure-JAX reference of the same interpreted semantics.

    Uses the stabilized logsumexp (mathematically identical to the naive
    smin); the naive form underflows to log(0) -> inf for diffs > ~2.7.
    """
    B, T, D = inp.shape
    tp = jnp.pad(target.astype(jnp.float32), ((0, 0), (1, 1), (1, 1)))
    diffs = []
    for dy, dx in _SHIFTS:
        tgt = tp[:, 1 + dy:1 + dy + T, 1 + dx:1 + dx + D]
        diffs.append(jnp.abs(inp.astype(jnp.float32) - tgt))
    diffs = jnp.stack(diffs, axis=-1)                        # (B, T, D, 9)
    center = diffs[..., 0]
    smin = -jax.nn.logsumexp(-_K * diffs, axis=-1) / _K
    jittered = 0.5 * (center + smin)
    if masked:
        mask = (jnp.arange(T)[None, :, None] < length[:, None, None])
        jittered = jittered * mask.astype(jnp.float32)
    return jnp.mean(jittered)


if __name__ == "__main__":
    key = jax.random.PRNGKey(0)
    k1, k2 = jax.random.split(key)

    # Lane-dense case: dim is a multiple of 128 (128-lane tiles, batch folded).
    # NOTE: the docstring calls `target` a LongTensor of class indices, but it
    # is used arithmetically; synthetic float32 values are used here.
    B, T, D = 4, 16, 128
    inp = jax.random.normal(k1, (B, T, D), dtype=jnp.float32)
    target = jax.random.normal(k2, (B, T, D), dtype=jnp.float32)
    length = jnp.array([12, 16, 5, 9], dtype=jnp.int32)

    loss = jitter_loss(inp, target, length, masked=True)
    jax.block_until_ready(loss)
    ref = _jitter_loss_ref(inp, target, length, masked=True)
    assert np.allclose(np.asarray(loss), np.asarray(ref), rtol=1e-4, atol=1e-5), (
        float(loss), float(ref))

    # Small-dim case (D < 128) exercising narrow lanes + batch folding.
    k3, k4 = jax.random.split(k2)
    B2, T2, D2 = 4, 8, 16
    inp2 = jax.random.normal(k3, (B2, T2, D2), dtype=jnp.float32)
    target2 = jax.random.normal(k4, (B2, T2, D2), dtype=jnp.float32)
    length2 = jnp.array([8, 3, 6, 1], dtype=jnp.int32)
    loss2 = jitter_loss(inp2, target2, length2, masked=True)
    jax.block_until_ready(loss2)
    ref2 = _jitter_loss_ref(inp2, target2, length2, masked=True)
    assert np.allclose(np.asarray(loss2), np.asarray(ref2), rtol=1e-4, atol=1e-5), (
        float(loss2), float(ref2))

    print("KERNEL_OK")
</pallas_src>

<mosaic_0001>
module attributes {stable_mosaic.version = 11 : i64} {
  func.func @_jitter_loss_kernel(%arg0: i32, %arg1: memref<4xi32, #tpu.memory_space<smem>>, %arg2: memref<2x16x128xf32, #tpu.memory_space<vmem>>, %arg3: memref<2x16x128xf32, #tpu.memory_space<vmem>>, %arg4: memref<2x1x128xf32, #tpu.memory_space<vmem>>, %arg5: memref<9x2x16x128xf32, #tpu.memory_space<vmem>>) attributes {dimension_semantics = [#tpu.dimension_semantics<parallel>], iteration_bounds = array<i64: 2>, scalar_prefetch = 1 : i64, scratch_operands = 1 : i64, tpu.core_type = #tpu.core_type<tc>, window_params = [{transform_indices = @transform_0, window_bounds = array<i64: 2, 16, 128>}, {transform_indices = @transform_1, window_bounds = array<i64: 2, 16, 128>}, {transform_indices = @transform_2, window_bounds = array<i64: 2, 1, 128>}]} {
    %c0 = arith.constant 0 : index
    %c0_0 = arith.constant 0 : index
    %c0_1 = arith.constant 0 : index
    %0 = vector.load %arg2[%c0, %c0_0, %c0_1] : memref<2x16x128xf32, #tpu.memory_space<vmem>>, vector<2x16x128xf32>
    %c0_2 = arith.constant 0 : index
    %c0_3 = arith.constant 0 : index
    %c0_4 = arith.constant 0 : index
    %1 = vector.load %arg3[%c0_2, %c0_3, %c0_4] : memref<2x16x128xf32, #tpu.memory_space<vmem>>, vector<2x16x128xf32>
    %2 = arith.subf %0, %1 : vector<2x16x128xf32>
    %3 = math.absf %2 : vector<2x16x128xf32>
    %c0_5 = arith.constant 0 : index
    %c0_6 = arith.constant 0 : index
    %c0_7 = arith.constant 0 : index
    %c0_8 = arith.constant 0 : index
    %4 = vector.load %arg5[%c0_5, %c0_6, %c0_7, %c0_8] : memref<9x2x16x128xf32, #tpu.memory_space<vmem>>, vector<1x2x16x128xf32>
    %5 = vector.shape_cast %4 : vector<1x2x16x128xf32> to vector<2x16x128xf32>
    %6 = vector.shape_cast %3 : vector<2x16x128xf32> to vector<1x2x16x128xf32>
    tpu.vector_store %arg5[%c0_5, %c0_6, %c0_7, %c0_8], %6 {strides = array<i32>} : memref<9x2x16x128xf32, #tpu.memory_space<vmem>>, vector<1x2x16x128xf32>,
    %cst = arith.constant 0.000000e+00 : f32
    %7 = vector.broadcast %cst : f32 to vector<2x1x128xf32>
    %8 = vector.extract_strided_slice %1 {offsets = [0, 1, 0], sizes = [2, 15, 128], strides = [1, 1, 1]} : vector<2x16x128xf32> to vector<2x15x128xf32>
    %9 = tpu.concatenate %8, %7 in 1 : vector<2x15x128xf32>, vector<2x1x128xf32> -> vector<2x16x128xf32>
    %10 = arith.subf %0, %9 : vector<2x16x128xf32>
    %11 = math.absf %10 : vector<2x16x128xf32>
    %c1 = arith.constant 1 : index
    %c0_9 = arith.constant 0 : index
    %c0_10 = arith.constant 0 : index
    %c0_11 = arith.constant 0 : index
    %12 = vector.load %arg5[%c1, %c0_9, %c0_10, %c0_11] : memref<9x2x16x128xf32, #tpu.memory_space<vmem>>, vector<1x2x16x128xf32>
    %13 = vector.shape_cast %12 : vector<1x2x16x128xf32> to vector<2x16x128xf32>
    %14 = vector.shape_cast %11 : vector<2x16x128xf32> to vector<1x2x16x128xf32>
    tpu.vector_store %arg5[%c1, %c0_9, %c0_10, %c0_11], %14 {strides = array<i32>} : memref<9x2x16x128xf32, #tpu.memory_space<vmem>>, vector<1x2x16x128xf32>,
    %15 = arith.minimumf %3, %11 : vector<2x16x128xf32>
    %cst_12 = arith.constant 0.000000e+00 : f32
    %16 = vector.broadcast %cst_12 : f32 to vector<2x1x128xf32>
    %17 = vector.extract_strided_slice %1 {offsets = [0, 0, 0], sizes = [2, 15, 128], strides = [1, 1, 1]} : vector<2x16x128xf32> to vector<2x15x128xf32>
    %18 = tpu.concatenate %16, %17 in 1 : vector<2x1x128xf32>, vector<2x15x128xf32> -> vector<2x16x128xf32>
    %19 = arith.subf %0, %18 : vector<2x16x128xf32>
    %20 = math.absf %19 : vector<2x16x128xf32>
    %c2 = arith.constant 2 : index
    %c0_13 = arith.constant 0 : index
    %c0_14 = arith.constant 0 : index
    %c0_15 = arith.constant 0 : index
    %21 = vector.load %arg5[%c2, %c0_13, %c0_14, %c0_15] : memref<9x2x16x128xf32, #tpu.memory_space<vmem>>, vector<1x2x16x128xf32>
    %22 = vector.shape_cast %21 : vector<1x2x16x128xf32> to vector<2x16x128xf32>
    %23 = vector.shape_cast %20 : vector<2x16x128xf32> to vector<1x2x16x128xf32>
    tpu.vector_store %arg5[%c2, %c0_13, %c0_14, %c0_15], %23 {strides = array<i32>} : memref<9x2x16x128xf32, #tpu.memory_space<vmem>>, vector<1x2x16x128xf32>,
    %24 = arith.minimumf %15, %20 : vector<2x16x128xf32>
    %cst_16 = arith.constant 0.000000e+00 : f32
    %25 = vector.broadcast %cst_16 : f32 to vector<2x16x1xf32>
    %26 = vector.extract_strided_slice %1 {offsets = [0, 0, 1], sizes = [2, 16, 127], strides = [1, 1, 1]} : vector<2x16x128xf32> to vector<2x16x127xf32>
    %27 = tpu.concatenate %26, %25 in 2 : vector<2x16x127xf32>, vector<2x16x1xf32> -> vector<2x16x128xf32>
    %28 = arith.subf %0, %27 : vector<2x16x128xf32>
    %29 = math.absf %28 : vector<2x16x128xf32>
    %c3 = arith.constant 3 : index
    %c0_17 = arith.constant 0 : index
    %c0_18 = arith.constant 0 : index
    %c0_19 = arith.constant 0 : index
    %30 = vector.load %arg5[%c3, %c0_17, %c0_18, %c0_19] : memref<9x2x16x128xf32, #tpu.memory_space<vmem>>, vector<1x2x16x128xf32>
    %31 = vector.shape_cast %30 : vector<1x2x16x128xf32> to vector<2x16x128xf32>
    %32 = vector.shape_cast %29 : vector<2x16x128xf32> to vector<1x2x16x128xf32>
    tpu.vector_store %arg5[%c3, %c0_17, %c0_18, %c0_19], %32 {strides = array<i32>} : memref<9x2x16x128xf32, #tpu.memory_space<vmem>>, vector<1x2x16x128xf32>,
    %33 = arith.minimumf %24, %29 : vector<2x16x128xf32>
    %cst_20 = arith.constant 0.000000e+00 : f32
    %34 = vector.broadcast %cst_20 : f32 to vector<2x16x1xf32>
    %35 = vector.extract_strided_slice %1 {offsets = [0, 0, 0], sizes = [2, 16, 127], strides = [1, 1, 1]} : vector<2x16x128xf32> to vector<2x16x127xf32>
    %36 = tpu.concatenate %34, %35 in 2 : vector<2x16x1xf32>, vector<2x16x127xf32> -> vector<2x16x128xf32>
    %37 = arith.subf %0, %36 : vector<2x16x128xf32>
    %38 = math.absf %37 : vector<2x16x128xf32>
    %c4 = arith.constant 4 : index
    %c0_21 = arith.constant 0 : index
    %c0_22 = arith.constant 0 : index
    %c0_23 = arith.constant 0 : index
    %39 = vector.load %arg5[%c4, %c0_21, %c0_22, %c0_23] : memref<9x2x16x128xf32, #tpu.memory_space<vmem>>, vector<1x2x16x128xf32>
    %40 = vector.shape_cast %39 : vector<1x2x16x128xf32> to vector<2x16x128xf32>
    %41 = vector.shape_cast %38 : vector<2x16x128xf32> to vector<1x2x16x128xf32>
    tpu.vector_store %arg5[%c4, %c0_21, %c0_22, %c0_23], %41 {strides = array<i32>} : memref<9x2x16x128xf32, #tpu.memory_space<vmem>>, vector<1x2x16x128xf32>,
    %42 = arith.minimumf %33, %38 : vector<2x16x128xf32>
    %cst_24 = arith.constant 0.000000e+00 : f32
    %43 = vector.broadcast %cst_24 : f32 to vector<2x1x128xf32>
    %44 = vector.extract_strided_slice %1 {offsets = [0, 1, 0], sizes = [2, 15, 128], strides = [1, 1, 1]} : vector<2x16x128xf32> to vector<2x15x128xf32>
    %45 = tpu.concatenate %44, %43 in 1 : vector<2x15x128xf32>, vector<2x1x128xf32> -> vector<2x16x128xf32>
    %cst_25 = arith.constant 0.000000e+00 : f32
    %46 = vector.broadcast %cst_25 : f32 to vector<2x16x1xf32>
    %47 = vector.extract_strided_slice %45 {offsets = [0, 0, 1], sizes = [2, 16, 127], strides = [1, 1, 1]} : vector<2x16x128xf32> to vector<2x16x127xf32>
    %48 = tpu.concatenate %47, %46 in 2 : vector<2x16x127xf32>, vector<2x16x1xf32> -> vector<2x16x128xf32>
    %49 = arith.subf %0, %48 : vector<2x16x128xf32>
    %50 = math.absf %49 : vector<2x16x128xf32>
    %c5 = arith.constant 5 : index
    %c0_26 = arith.constant 0 : index
    %c0_27 = arith.constant 0 : index
    %c0_28 = arith.constant 0 : index
    %51 = vector.load %arg5[%c5, %c0_26, %c0_27, %c0_28] : memref<9x2x16x128xf32, #tpu.memory_space<vmem>>, vector<1x2x16x128xf32>
    %52 = vector.shape_cast %51 : vector<1x2x16x128xf32> to vector<2x16x128xf32>
    %53 = vector.shape_cast %50 : vector<2x16x128xf32> to vector<1x2x16x128xf32>
    tpu.vector_store %arg5[%c5, %c0_26, %c0_27, %c0_28], %53 {strides = array<i32>} : memref<9x2x16x128xf32, #tpu.memory_space<vmem>>, vector<1x2x16x128xf32>,
    %54 = arith.minimumf %42, %50 : vector<2x16x128xf32>
    %cst_29 = arith.constant 0.000000e+00 : f32
    %55 = vector.broadcast %cst_29 : f32 to vector<2x1x128xf32>
    %56 = vector.extract_strided_slice %1 {offsets = [0, 0, 0], sizes = [2, 15, 128], strides = [1, 1, 1]} : vector<2x16x128xf32> to vector<2x15x128xf32>
    %57 = tpu.concatenate %55, %56 in 1 : vector<2x1x128xf32>, vector<2x15x128xf32> -> vector<2x16x128xf32>
    %cst_30 = arith.constant 0.000000e+00 : f32
    %58 = vector.broadcast %cst_30 : f32 to vector<2x16x1xf32>
    %59 = vector.extract_strided_slice %57 {offsets = [0, 0, 0], sizes = [2, 16, 127], strides = [1, 1, 1]} : vector<2x16x128xf32> to vector<2x16x127xf32>
    %60 = tpu.concatenate %58, %59 in 2 : vector<2x16x1xf32>, vector<2x16x127xf32> -> vector<2x16x128xf32>
    %61 = arith.subf %0, %60 : vector<2x16x128xf32>
    %62 = math.absf %61 : vector<2x16x128xf32>
    %c6 = arith.constant 6 : index
    %c0_31 = arith.constant 0 : index
    %c0_32 = arith.constant 0 : index
    %c0_33 = arith.constant 0 : index
    %63 = vector.load %arg5[%c6, %c0_31, %c0_32, %c0_33] : memref<9x2x16x128xf32, #tpu.memory_space<vmem>>, vector<1x2x16x128xf32>
    %64 = vector.shape_cast %63 : vector<1x2x16x128xf32> to vector<2x16x128xf32>
    %65 = vector.shape_cast %62 : vector<2x16x128xf32> to vector<1x2x16x128xf32>
    tpu.vector_store %arg5[%c6, %c0_31, %c0_32, %c0_33], %65 {strides = array<i32>} : memref<9x2x16x128xf32, #tpu.memory_space<vmem>>, vector<1x2x16x128xf32>,
    %66 = arith.minimumf %54, %62 : vector<2x16x128xf32>
    %cst_34 = arith.constant 0.000000e+00 : f32
    %67 = vector.broadcast %cst_34 : f32 to vector<2x1x128xf32>
    %68 = vector.extract_strided_slice %1 {offsets = [0, 1, 0], sizes = [2, 15, 128], strides = [1, 1, 1]} : vector<2x16x128xf32> to vector<2x15x128xf32>
    %69 = tpu.concatenate %68, %67 in 1 : vector<2x15x128xf32>, vector<2x1x128xf32> -> vector<2x16x128xf32>
    %cst_35 = arith.constant 0.000000e+00 : f32
    %70 = vector.broadcast %cst_35 : f32 to vector<2x16x1xf32>
    %71 = vector.extract_strided_slice %69 {offsets = [0, 0, 0], sizes = [2, 16, 127], strides = [1, 1, 1]} : vector<2x16x128xf32> to vector<2x16x127xf32>
    %72 = tpu.concatenate %70, %71 in 2 : vector<2x16x1xf32>, vector<2x16x127xf32> -> vector<2x16x128xf32>
    %73 = arith.subf %0, %72 : vector<2x16x128xf32>
    %74 = math.absf %73 : vector<2x16x128xf32>
    %c7 = arith.constant 7 : index
    %c0_36 = arith.constant 0 : index
    %c0_37 = arith.constant 0 : index
    %c0_38 = arith.constant 0 : index
    %75 = vector.load %arg5[%c7, %c0_36, %c0_37, %c0_38] : memref<9x2x16x128xf32, #tpu.memory_space<vmem>>, vector<1x2x16x128xf32>
    %76 = vector.shape_cast %75 : vector<1x2x16x128xf32> to vector<2x16x128xf32>
    %77 = vector.shape_cast %74 : vector<2x16x128xf32> to vector<1x2x16x128xf32>
    tpu.vector_store %arg5[%c7, %c0_36, %c0_37, %c0_38], %77 {strides = array<i32>} : memref<9x2x16x128xf32, #tpu.memory_space<vmem>>, vector<1x2x16x128xf32>,
    %78 = arith.minimumf %66, %74 : vector<2x16x128xf32>
    %cst_39 = arith.constant 0.000000e+00 : f32
    %79 = vector.broadcast %cst_39 : f32 to vector<2x1x128xf32>
    %80 = vector.extract_strided_slice %1 {offsets = [0, 0, 0], sizes = [2, 15, 128], strides = [1, 1, 1]} : vector<2x16x128xf32> to vector<2x15x128xf32>
    %81 = tpu.concatenate %79, %80 in 1 : vector<2x1x128xf32>, vector<2x15x128xf32> -> vector<2x16x128xf32>
    %cst_40 = arith.constant 0.000000e+00 : f32
    %82 = vector.broadcast %cst_40 : f32 to vector<2x16x1xf32>
    %83 = vector.extract_strided_slice %81 {offsets = [0, 0, 1], sizes = [2, 16, 127], strides = [1, 1, 1]} : vector<2x16x128xf32> to vector<2x16x127xf32>
    %84 = tpu.concatenate %83, %82 in 2 : vector<2x16x127xf32>, vector<2x16x1xf32> -> vector<2x16x128xf32>
    %85 = arith.subf %0, %84 : vector<2x16x128xf32>
    %86 = math.absf %85 : vector<2x16x128xf32>
    %c8 = arith.constant 8 : index
    %c0_41 = arith.constant 0 : index
    %c0_42 = arith.constant 0 : index
    %c0_43 = arith.constant 0 : index
    %87 = vector.load %arg5[%c8, %c0_41, %c0_42, %c0_43] : memref<9x2x16x128xf32, #tpu.memory_space<vmem>>, vector<1x2x16x128xf32>
    %88 = vector.shape_cast %87 : vector<1x2x16x128xf32> to vector<2x16x128xf32>
    %89 = vector.shape_cast %86 : vector<2x16x128xf32> to vector<1x2x16x128xf32>
    tpu.vector_store %arg5[%c8, %c0_41, %c0_42, %c0_43], %89 {strides = array<i32>} : memref<9x2x16x128xf32, #tpu.memory_space<vmem>>, vector<1x2x16x128xf32>,
    %90 = arith.minimumf %78, %86 : vector<2x16x128xf32>
    %c0_44 = arith.constant 0 : index
    %c0_45 = arith.constant 0 : index
    %c0_46 = arith.constant 0 : index
    %c0_47 = arith.constant 0 : index
    %91 = vector.load %arg5[%c0_44, %c0_45, %c0_46, %c0_47] : memref<9x2x16x128xf32, #tpu.memory_space<vmem>>, vector<1x2x16x128xf32>
    %92 = vector.shape_cast %91 : vector<1x2x16x128xf32> to vector<2x16x128xf32>
    %93 = arith.subf %92, %90 : vector<2x16x128xf32>
    %cst_48 = arith.constant -3.200000e+01 : f32
    %94 = vector.broadcast %cst_48 : f32 to vector<2x16x128xf32>
    %95 = arith.mulf %94, %93 : vector<2x16x128xf32>
    %96 = math.exp %95 : vector<2x16x128xf32>
    %c1_49 = arith.constant 1 : index
    %c0_50 = arith.constant 0 : index
    %c0_51 = arith.constant 0 : index
    %c0_52 = arith.constant 0 : index
    %97 = vector.load %arg5[%c1_49, %c0_50, %c0_51, %c0_52] : memref<9x2x16x128xf32, #tpu.memory_space<vmem>>, vector<1x2x16x128xf32>
    %98 = vector.shape_cast %97 : vector<1x2x16x128xf32> to vector<2x16x128xf32>
    %99 = arith.subf %98, %90 : vector<2x16x128xf32>
    %cst_53 = arith.constant -3.200000e+01 : f32
    %100 = vector.broadcast %cst_53 : f32 to vector<2x16x128xf32>
    %101 = arith.mulf %100, %99 : vector<2x16x128xf32>
    %102 = math.exp %101 : vector<2x16x128xf32>
    %103 = arith.addf %96, %102 : vector<2x16x128xf32>
    %c2_54 = arith.constant 2 : index
    %c0_55 = arith.constant 0 : index
    %c0_56 = arith.constant 0 : index
    %c0_57 = arith.constant 0 : index
    %104 = vector.load %arg5[%c2_54, %c0_55, %c0_56, %c0_57] : memref<9x2x16x128xf32, #tpu.memory_space<vmem>>, vector<1x2x16x128xf32>
    %105 = vector.shape_cast %104 : vector<1x2x16x128xf32> to vector<2x16x128xf32>
    %106 = arith.subf %105, %90 : vector<2x16x128xf32>
    %cst_58 = arith.constant -3.200000e+01 : f32
    %107 = vector.broadcast %cst_58 : f32 to vector<2x16x128xf32>
    %108 = arith.mulf %107, %106 : vector<2x16x128xf32>
    %109 = math.exp %108 : vector<2x16x128xf32>
    %110 = arith.addf %103, %109 : vector<2x16x128xf32>
    %c3_59 = arith.constant 3 : index
    %c0_60 = arith.constant 0 : index
    %c0_61 = arith.constant 0 : index
    %c0_62 = arith.constant 0 : index
    %111 = vector.load %arg5[%c3_59, %c0_60, %c0_61, %c0_62] : memref<9x2x16x128xf32, #tpu.memory_space<vmem>>, vector<1x2x16x128xf32>
    %112 = vector.shape_cast %111 : vector<1x2x16x128xf32> to vector<2x16x128xf32>
    %113 = arith.subf %112, %90 : vector<2x16x128xf32>
    %cst_63 = arith.constant -3.200000e+01 : f32
    %114 = vector.broadcast %cst_63 : f32 to vector<2x16x128xf32>
    %115 = arith.mulf %114, %113 : vector<2x16x128xf32>
    %116 = math.exp %115 : vector<2x16x128xf32>
    %117 = arith.addf %110, %116 : vector<2x16x128xf32>
    %c4_64 = arith.constant 4 : index
    %c0_65 = arith.constant 0 : index
    %c0_66 = arith.constant 0 : index
    %c0_67 = arith.constant 0 : index
    %118 = vector.load %arg5[%c4_64, %c0_65, %c0_66, %c0_67] : memref<9x2x16x128xf32, #tpu.memory_space<vmem>>, vector<1x2x16x128xf32>
    %119 = vector.shape_cast %118 : vector<1x2x16x128xf32> to vector<2x16x128xf32>
    %120 = arith.subf %119, %90 : vector<2x16x128xf32>
    %cst_68 = arith.constant -3.200000e+01 : f32
    %121 = vector.broadcast %cst_68 : f32 to vector<2x16x128xf32>
    %122 = arith.mulf %121, %120 : vector<2x16x128xf32>
    %123 = math.exp %122 : vector<2x16x128xf32>
    %124 = arith.addf %117, %123 : vector<2x16x128xf32>
    %c5_69 = arith.constant 5 : index
    %c0_70 = arith.constant 0 : index
    %c0_71 = arith.constant 0 : index
    %c0_72 = arith.constant 0 : index
    %125 = vector.load %arg5[%c5_69, %c0_70, %c0_71, %c0_72] : memref<9x2x16x128xf32, #tpu.memory_space<vmem>>, vector<1x2x16x128xf32>
    %126 = vector.shape_cast %125 : vector<1x2x16x128xf32> to vector<2x16x128xf32>
    %127 = arith.subf %126, %90 : vector<2x16x128xf32>
    %cst_73 = arith.constant -3.200000e+01 : f32
    %128 = vector.broadcast %cst_73 : f32 to vector<2x16x128xf32>
    %129 = arith.mulf %128, %127 : vector<2x16x128xf32>
    %130 = math.exp %129 : vector<2x16x128xf32>
    %131 = arith.addf %124, %130 : vector<2x16x128xf32>
    %c6_74 = arith.constant 6 : index
    %c0_75 = arith.constant 0 : index
    %c0_76 = arith.constant 0 : index
    %c0_77 = arith.constant 0 : index
    %132 = vector.load %arg5[%c6_74, %c0_75, %c0_76, %c0_77] : memref<9x2x16x128xf32, #tpu.memory_space<vmem>>, vector<1x2x16x128xf32>
    %133 = vector.shape_cast %132 : vector<1x2x16x128xf32> to vector<2x16x128xf32>
    %134 = arith.subf %133, %90 : vector<2x16x128xf32>
    %cst_78 = arith.constant -3.200000e+01 : f32
    %135 = vector.broadcast %cst_78 : f32 to vector<2x16x128xf32>
    %136 = arith.mulf %135, %134 : vector<2x16x128xf32>
    %137 = math.exp %136 : vector<2x16x128xf32>
    %138 = arith.addf %131, %137 : vector<2x16x128xf32>
    %c7_79 = arith.constant 7 : index
    %c0_80 = arith.constant 0 : index
    %c0_81 = arith.constant 0 : index
    %c0_82 = arith.constant 0 : index
    %139 = vector.load %arg5[%c7_79, %c0_80, %c0_81, %c0_82] : memref<9x2x16x128xf32, #tpu.memory_space<vmem>>, vector<1x2x16x128xf32>
    %140 = vector.shape_cast %139 : vector<1x2x16x128xf32> to vector<2x16x128xf32>
    %141 = arith.subf %140, %90 : vector<2x16x128xf32>
    %cst_83 = arith.constant -3.200000e+01 : f32
    %142 = vector.broadcast %cst_83 : f32 to vector<2x16x128xf32>
    %143 = arith.mulf %142, %141 : vector<2x16x128xf32>
    %144 = math.exp %143 : vector<2x16x128xf32>
    %145 = arith.addf %138, %144 : vector<2x16x128xf32>
    %c8_84 = arith.constant 8 : index
    %c0_85 = arith.constant 0 : index
    %c0_86 = arith.constant 0 : index
    %c0_87 = arith.constant 0 : index
    %146 = vector.load %arg5[%c8_84, %c0_85, %c0_86, %c0_87] : memref<9x2x16x128xf32, #tpu.memory_space<vmem>>, vector<1x2x16x128xf32>
    %147 = vector.shape_cast %146 : vector<1x2x16x128xf32> to vector<2x16x128xf32>
    %148 = arith.subf %147, %90 : vector<2x16x128xf32>
    %cst_88 = arith.constant -3.200000e+01 : f32
    %149 = vector.broadcast %cst_88 : f32 to vector<2x16x128xf32>
    %150 = arith.mulf %149, %148 : vector<2x16x128xf32>
    %151 = math.exp %150 : vector<2x16x128xf32>
    %152 = arith.addf %145, %151 : vector<2x16x128xf32>
    %153 = math.log %152 : vector<2x16x128xf32>
    %cst_89 = arith.constant 3.125000e-02 : f32
    %154 = vector.broadcast %cst_89 : f32 to vector<2x16x128xf32>
    %155 = arith.mulf %153, %154 : vector<2x16x128xf32>
    %156 = arith.subf %90, %155 : vector<2x16x128xf32>
    %c0_90 = arith.constant 0 : index
    %c0_91 = arith.constant 0 : index
    %c0_92 = arith.constant 0 : index
    %c0_93 = arith.constant 0 : index
    %157 = vector.load %arg5[%c0_90, %c0_91, %c0_92, %c0_93] : memref<9x2x16x128xf32, #tpu.memory_space<vmem>>, vector<1x2x16x128xf32>
    %158 = vector.shape_cast %157 : vector<1x2x16x128xf32> to vector<2x16x128xf32>
    %159 = arith.addf %158, %156 : vector<2x16x128xf32>
    %cst_94 = arith.constant 5.000000e-01 : f32
    %160 = vector.broadcast %cst_94 : f32 to vector<2x16x128xf32>
    %161 = arith.mulf %160, %159 : vector<2x16x128xf32>
    %cst_95 = arith.constant dense<0.000000e+00> : vector<2x16xf32>
    %162 = vector.multi_reduction <add>, %161, %cst_95 [2] : vector<2x16x128xf32> to vector<2x16xf32>
    %163 = vector.shape_cast %162 : vector<2x16xf32> to vector<2x16x1xf32>
    %164 = tpu.iota {dimensions = array<i32: 0>} : vector<16x1xi32>
    %cst_96 = arith.constant 0.000000e+00 : f32
    %165 = vector.broadcast %cst_96 : f32 to vector<1x128xf32>
    %c2_i32 = arith.constant 2 : i32
    %166 = arith.muli %arg0, %c2_i32 : i32
    %c0_i32 = arith.constant 0 : i32
    %167 = arith.addi %166, %c0_i32 : i32
    %168 = arith.index_cast %167 : i32 to index
    %169 = memref.load %arg1[%168] : memref<4xi32, #tpu.memory_space<smem>>
    %170 = vector.broadcast %169 : i32 to vector<16x1xi32>
    %171 = arith.cmpi slt, %164, %170 : vector<16x1xi32>
    %172 = arith.extui %171 : vector<16x1xi1> to vector<16x1xi32>
    %173 = arith.sitofp %172 : vector<16x1xi32> to vector<16x1xf32>
    %174 = vector.extract_strided_slice %163 {offsets = [0, 0, 0], sizes = [1, 16, 1], strides = [1, 1, 1]} : vector<2x16x1xf32> to vector<1x16x1xf32>
    %175 = vector.shape_cast %174 : vector<1x16x1xf32> to vector<16x1xf32>
    %176 = arith.mulf %175, %173 : vector<16x1xf32>
    %177 = vector.shape_cast %176 : vector<16x1xf32> to vector<1x16x1xf32>
    %cst_97 = arith.constant dense<0.000000e+00> : vector<1xf32>
    %178 = vector.multi_reduction <add>, %177, %cst_97 [1, 2] : vector<1x16x1xf32> to vector<1xf32>
    %179 = vector.shape_cast %178 : vector<1xf32> to vector<1x1x1xf32>
    %180 = vector.extract %179[0, 0, 0] : f32 from vector<1x1x1xf32>
    %181 = vector.broadcast %180 : f32 to vector<1x128xf32>
    %182 = arith.addf %165, %181 : vector<1x128xf32>
    %c0_98 = arith.constant 0 : index
    %c0_99 = arith.constant 0 : index
    %c0_100 = arith.constant 0 : index
    %183 = vector.load %arg4[%c0_98, %c0_99, %c0_100] : memref<2x1x128xf32, #tpu.memory_space<vmem>>, vector<1x1x128xf32>
    %184 = vector.shape_cast %183 : vector<1x1x128xf32> to vector<1x128xf32>
    %185 = vector.shape_cast %182 : vector<1x128xf32> to vector<1x1x128xf32>
    tpu.vector_store %arg4[%c0_98, %c0_99, %c0_100], %185 {strides = array<i32>} : memref<2x1x128xf32, #tpu.memory_space<vmem>>, vector<1x1x128xf32>,
    %c2_i32_101 = arith.constant 2 : i32
    %186 = arith.muli %arg0, %c2_i32_101 : i32
    %c1_i32 = arith.constant 1 : i32
    %187 = arith.addi %186, %c1_i32 : i32
    %188 = arith.index_cast %187 : i32 to index
    %189 = memref.load %arg1[%188] : memref<4xi32, #tpu.memory_space<smem>>
    %190 = vector.broadcast %189 : i32 to vector<16x1xi32>
    %191 = arith.cmpi slt, %164, %190 : vector<16x1xi32>
    %192 = arith.extui %191 : vector<16x1xi1> to vector<16x1xi32>
    %193 = arith.sitofp %192 : vector<16x1xi32> to vector<16x1xf32>
    %194 = vector.extract_strided_slice %163 {offsets = [1, 0, 0], sizes = [1, 16, 1], strides = [1, 1, 1]} : vector<2x16x1xf32> to vector<1x16x1xf32>
    %195 = vector.shape_cast %194 : vector<1x16x1xf32> to vector<16x1xf32>
    %196 = arith.mulf %195, %193 : vector<16x1xf32>
    %197 = vector.shape_cast %196 : vector<16x1xf32> to vector<1x16x1xf32>
    %cst_102 = arith.constant dense<0.000000e+00> : vector<1xf32>
    %198 = vector.multi_reduction <add>, %197, %cst_102 [1, 2] : vector<1x16x1xf32> to vector<1xf32>
    %199 = vector.shape_cast %198 : vector<1xf32> to vector<1x1x1xf32>
    %200 = vector.extract %199[0, 0, 0] : f32 from vector<1x1x1xf32>
    %201 = vector.broadcast %200 : f32 to vector<1x128xf32>
    %202 = arith.addf %165, %201 : vector<1x128xf32>
    %c1_103 = arith.constant 1 : index
    %c0_104 = arith.constant 0 : index
    %c0_105 = arith.constant 0 : index
    %203 = vector.load %arg4[%c1_103, %c0_104, %c0_105] : memref<2x1x128xf32, #tpu.memory_space<vmem>>, vector<1x1x128xf32>
    %204 = vector.shape_cast %203 : vector<1x1x128xf32> to vector<1x128xf32>
    %205 = vector.shape_cast %202 : vector<1x128xf32> to vector<1x1x128xf32>
    tpu.vector_store %arg4[%c1_103, %c0_104, %c0_105], %205 {strides = array<i32>} : memref<2x1x128xf32, #tpu.memory_space<vmem>>, vector<1x1x128xf32>,
    return
  }
  func.func @transform_0(%arg0: i32, %arg1: memref<4xi32, #tpu.memory_space<smem>>) -> (i32, i32, i32) {
    %c0_i32 = arith.constant 0 : i32
    %c0_i32_0 = arith.constant 0 : i32
    %c0_i32_1 = arith.constant 0 : i32
    return %arg0, %c0_i32, %c0_i32_0 : i32, i32, i32
  }
  func.func @transform_1(%arg0: i32, %arg1: memref<4xi32, #tpu.memory_space<smem>>) -> (i32, i32, i32) {
    %c0_i32 = arith.constant 0 : i32
    %c0_i32_0 = arith.constant 0 : i32
    %c0_i32_1 = arith.constant 0 : i32
    return %arg0, %c0_i32, %c0_i32_0 : i32, i32, i32
  }
  func.func @transform_2(%arg0: i32, %arg1: memref<4xi32, #tpu.memory_space<smem>>) -> (i32, i32, i32) {
    %c0_i32 = arith.constant 0 : i32
    %c0_i32_0 = arith.constant 0 : i32
    %c0_i32_1 = arith.constant 0 : i32
    return %arg0, %c0_i32, %c0_i32_0 : i32, i32, i32
  }
}

</mosaic_0001>

<bundles_post_ra>
// kernel: tpu_custom_call.1
= control target key start
LH: loop header
LB: loop body
LE: loop exit
PB: predicated region body
PF: predicated region fallthrough
CT: control target
= control target key end

     0   :  { %s1804_s0 = inlined_call_operand.hbm [shape: s32[4], index: 0, kind: input, shape index: {}]   ;;  %s1805_s1 = inlined_call_operand.hbm [shape: f32[4,16,128], index: 1, kind: input, shape index: {}]   ;;  %s1806_s2 = inlined_call_operand.hbm [shape: f32[4,16,128], index: 2, kind: input, shape index: {}]   ;;  %s1807_s3 = inlined_call_operand.hbm [shape: f32[4,1,128], index: 3, kind: output, shape index: {}]  }
   0x1   :  { %s1083_s14 = scalar_lea.hbm %s1804_s0, 16 }
   0x2   :  { %p1084_p0 = scmp.ne.s32.totalorder %s1804_s0, %s1083_s14  ;;  %p1087_p1 = scmp.lt.u32.totalorder %s1083_s14, %s1804_s0 }
   0x4   :  { %p1089_p2 = pnand %p1087_p1, %p1084_p0 }
   0x6   :  { %1092 = shalt.err (!%p1089_p2)  }
   0x7   :  { %s1227_s19 = smov [#allocation4]  }
   0x8   :  { %9 = dma.hbm_to_smem %s1804_s0, 16, %s1227_s19, [#allocation3] }
   0x9   :  { %1197 = dma.done.wait [#allocation3], 16 }
   0xa   :  { %1198 = vsyncadd [#allocation3], 4294967280 }
   0xb   :  { %11 = sfence }
   0xc   :  { %12 = vsyncpa [#allocation6], 0 }
   0xd   :  { %14 = vsyncpa [#allocation6 + $0x1], 0 }
   0xe   :  { %15 = vsyncpa [#allocation9], 0 }
   0xf   :  { %17 = vsyncpa [#allocation9 + $0x1], 0 }
  0x10   :  { %18 = vsyncpa [#allocation7], 0 }
  0x11   :  { %20 = vsyncpa [#allocation7 + $0x1], 0  ;;  %s1269_s22 = smov 0   ;;  %s1271_s23 = smov 0  }
  0x12   :  { %s1273_s24 = smov 0   ;;  %s1275_s25 = smov 0  }
  0x13 LB: > { %s1290_s0 = sadd.s32 4294967295, %s1225_s25   ;;  %s910_s26 = sadd.s32 4294967294, %s1225_s25   ;;  %s1225_s25 = sphi %s1275_s25, %s1823_s25   ;;  %s1221_s24 = sphi %s1273_s24, %s1822_s24   ;;  %s1217_s23 = sphi %s1271_s23, %s1821_s23   ;;  %s1213_s22 = sphi %s1269_s22, %s1820_s22  }
  0x14   : > { %s1294_s27 = sadd.s32 1, %s1225_s25   ;;  %s33_s28 = sadd.s32 1, %s1221_s24 }
  0x15   : > { %s30_s29 = ssub.s32 %s1225_s25, %s1294_s27  ;;  %p40_p3 = scmp.ne.s32.totalorder %s1221_s24, %s1217_s23 }
  0x16   : > { %p31_p4 = scmp.eq.s32.totalorder %s30_s29, 0  ;;  %p41_p5 = scmp.eq.s32.totalorder %s1225_s25, 0 }
  0x17   : > { %p46_p6 = scmp.ne.s32.totalorder %s1217_s23, %s1213_s22  ;;  %p47_p7 = scmp.eq.s32.totalorder %s1290_s0, 0 }
  0x18   : > { %s1306_s30 = scalar_select %p31_p4, %s1221_s24, %s33_s28  }
  0x19   : > { %p1308_p8 = por %p41_p5, %p40_p3  ;;  %p1312_p9 = por %p47_p7, %p46_p6 }
  0x1a   : > { %p96_p10 = scmp.eq.s32.totalorder %s1290_s0, 1  ;;  %p102_p11 = scmp.eq.s32.totalorder %s910_s26, 1 }
  0x1b   : > { %s1811_s5 = scalar_select %p1312_p9, 1, 0 }
  0x1c   : > { %p962_p13 = scmp.lt.s32.totalorder %s1225_s25, 2  ;;  %p1319_p0 = por %p96_p10, %p40_p3 }
  0x1d   : > { %p1323_p1 = por %p102_p11, %p46_p6  ;;  %s1328_s8 = sand.u32 1, %s1221_s24  }
  0x1e   : > { %s1812_s6 = scalar_select %p1319_p0, 1, 0 }
  0x1f   : > { %s1813_s7 = scalar_select %p1323_p1, 1, 0 }
  0x20   : > { %s937_s9 = sshll.u32 %s1225_s25, 9  ;;  %s913_s10 = sshll.u32 %s1328_s8, 5 }
  0x21   : > { %s1337_s13 = scalar_lea.hbm %s1805_s1, %s937_s9  ;;  %s126_s14 = scalar_lea.vmem [#allocation5], %s913_s10 }
  0x22   : > { %s134_s15 = sshll.u32 %s126_s14, 4  ;;  %p1343_p2 = pnand %p962_p13, %p1308_p8  ;;  %s1347_s15 = int_to_ptr.vmem [resolvable:$true] %s134_s15 }
  0x23   : > { %s123_s17 = scalar_lea.sflag [#allocation6], %s1328_s8  ;;  %s1093_s18 = scalar_lea.hbm %s1337_s13, 512 }
  0x24   : > { %p1094_p3 = scmp.ne.s32.totalorder %s1337_s13, %s1093_s18  ;;  %p1095_p4 = pneg %p1343_p2 }
  0x25   : > { %s1098_s21 = scalar_lea.hbm %s1805_s1, 1024  ;;  %p1099_p7 = scmp.lt.u32.totalorder %s1337_s13, %s1805_s1 }
  0x26   : > { %p1096_p5 = pnand %p1095_p4, %p1094_p3  ;;  %p1100_p8 = scmp.lt.u32.totalorder %s1098_s21, %s1093_s18 }
  0x27   : > { %p1102_p11 = scmp.lt.u32.totalorder %s1093_s18, %s1337_s13 }
  0x28   : > { %p1097_p6 = pneg %p1096_p5  ;;  %p1101_p10 = por %p1100_p8, %p1099_p7 }
  0x2a   : > { %p1103_p13 = por %p1102_p11, %p1101_p10 }
  0x2c   : > { %p1104_p12 = pnand %p1103_p13, %p1097_p6 }
  0x2e   : > { %1107 = shalt.err (!%p1104_p12)
}
  0x2f   : > { %s1108_s29 = scalar_lea.vmem %s1347_s15, 512  ;;  %s1228_s4 = smov [#allocation5]  }
  0x30   : > { %p1109_p3 = scmp.ne.s32.totalorder %s1347_s15, %s1108_s29  ;;  %s1113_s11 = sshll.u32 %s1228_s4, 4  ;;  %s1114_s11 = int_to_ptr.vmem [resolvable:$false] %s1113_s11 }
  0x31   : > { %s1115_s12 = scalar_lea.vmem %s1114_s11, 1024  ;;  %p1116_p0 = scmp.lt.s32.totalorder %s1347_s15, %s1114_s11 }
  0x32   : > { %p1111_p5 = pnand %p1109_p3, %p1095_p4  ;;  %p1117_p7 = scmp.lt.s32.totalorder %s1115_s12, %s1108_s29 }
  0x34   : > { %p1112_p1 = pneg %p1111_p5  ;;  %p1118_p8 = por %p1117_p7, %p1116_p0 }
  0x36   : > { %p1119_p10 = pnand %p1118_p8, %p1112_p1 }
  0x38   : > { %1122 = shalt.err (!%p1119_p10)
}
  0x39   : > { %s1229_s14 = smov 128   ;;  %s1230_s18 = smov 8  }
  0x3a   : > { %954 = dma.hbm_to_vmem [thread:$0]  (!%p1343_p2), %s1337_s13, 512, %s1347_s15, %s123_s17, %s1229_s14, %s1229_s14, %s1230_s18  }
  0x3b   : > { %p921_p12 = scmp.ge.s32.totalorder %s1225_s25, 1  ;;  %p164_p0 = scmp.lt.s32.totalorder %s1225_s25, 3 }
  0x3c   : > { %s1391_s26 = scalar_lea.hbm %s1806_s2, %s937_s9  ;;  %s148_s28 = scalar_lea.vmem [#allocation8], %s913_s10 }
  0x3d   : > { %p1382_p1 = pnand %p921_p12, %p164_p0  ;;  %s156_s29 = sshll.u32 %s148_s28, 4  ;;  %s1395_s29 = int_to_ptr.vmem [resolvable:$true] %s156_s29 }
  0x3e   : > { %s145_s13 = scalar_lea.sflag [#allocation9], %s1328_s8  ;;  %s1123_s15 = scalar_lea.hbm %s1391_s26, 512 }
  0x3f   : > { %p1124_p6 = scmp.ne.s32.totalorder %s1391_s26, %s1123_s15  ;;  %s1128_s9 = scalar_lea.hbm %s1806_s2, 1024 }
  0x40   : > { %p1129_p3 = scmp.lt.u32.totalorder %s1391_s26, %s1806_s2  ;;  %p1130_p5 = scmp.lt.u32.totalorder %s1128_s9, %s1123_s15 }
  0x41   : > { %p1126_p11 = pnand %p1124_p6, %p1095_p4  ;;  %p1132_p8 = scmp.lt.u32.totalorder %s1123_s15, %s1391_s26 }
  0x42   : > { %p1131_p7 = por %p1130_p5, %p1129_p3 }
  0x43   : > { %p1127_p13 = pneg %p1126_p11 }
  0x44   : > { %p1133_p10 = por %p1132_p8, %p1131_p7 }
  0x46   : > { %p1134_p12 = pnand %p1133_p10, %p1127_p13 }
  0x48   : > { %1137 = shalt.err (!%p1134_p12)
}
  0x49   : > { %s1138_s10 = scalar_lea.vmem %s1395_s29, 512  ;;  %s1231_s20 = smov [#allocation8]  }
  0x4a   : > { %p1139_p0 = scmp.ne.s32.totalorder %s1395_s29, %s1138_s10  ;;  %s1143_s21 = sshll.u32 %s1231_s20, 4  ;;  %s1144_s21 = int_to_ptr.vmem [resolvable:$false] %s1143_s21 }
  0x4b   : > { %s1145_s28 = scalar_lea.vmem %s1144_s21, 1024  ;;  %p1146_p9 = scmp.lt.s32.totalorder %s1395_s29, %s1144_s21 }
  0x4c   : > { %p1141_p6 = pnand %p1139_p0, %p1095_p4  ;;  %p1147_p3 = scmp.lt.s32.totalorder %s1145_s28, %s1138_s10 }
  0x4e   : > { %p1142_p11 = pneg %p1141_p6  ;;  %p1148_p5 = por %p1147_p3, %p1146_p9 }
  0x50   : > { %p1149_p7 = pnand %p1148_p5, %p1142_p11 }
  0x52   : > { %1152 = shalt.err (!%p1149_p7)
}
  0x53   : > { %957 = dma.hbm_to_vmem [thread:$0]  (!%p1343_p2), %s1391_s26, 512, %s1395_s29, %s145_s13, %s1229_s14, %s1229_s14, %s1230_s18  }
  0x54   : > { %168 = sbr.rel (%p1382_p1) target bundleno = 706 (0x2c2), region = 28  ;;  %s1429_s15 = sand.u32 (!%p1382_p1), 1, %s1217_s23  }
  0x55   : > { %s922_s17 = sshll.u32 (!%p1382_p1), %s1429_s15, 5  ;;  %s171_s4 = scalar_lea.sflag (!%p1382_p1), [#allocation6], %s1429_s15 }
  0x56   : > { %s174_s16 = scalar_lea.vmem (!%p1382_p1), [#allocation5], %s922_s17  ;;  %p1816_p9 = scmp.ne.s32.totalorder (!%p1382_p1), %s1811_s5, 0 }
  0x5b   : > { %1200 = dma.done.wait (%p1816_p9), %s171_s4, 512  }
  0x5c   : > { %1202 = vsyncadd (%p1816_p9), %s171_s4, 4294966784  ;;  %s180_s8 = scalar_lea.sflag [#allocation9], %s1429_s15  ;;  %s183_s14 = scalar_lea.vmem [#allocation8], %s922_s17 }
  0x5d   : > { %1204 = dma.done.wait (%p1816_p9), %s180_s8, 512  }
  0x5e   : > { %1206 = vsyncadd (%p1816_p9), %s180_s8, 4294966784  ;;  %v218_v0 = vld [vmem:[%s183_s14 + $0x10] sm:$0xff]  ;;  %v216_v1 = vld [vmem:[%s183_s14] sm:$0xff]  ;;  %vm236_vm0 = vcmask 1046528   ;;  %s1232_s18 = smov 127   ;;  %vm266_vm1 = vcmask 1040384  }
  0x5f   : > { %v219_v2 = vld [vmem:[%s183_s14 + $0x18] sm:$0xff]  ;;  %300 = vrot.lane.b32.xlu1 %v218_v0, %s1232_s18  ;;  %296 = vrot.lane.b32.xlu0 %v216_v1, %s1232_s18  ;;  %v217_v3 = vld [vmem:[%s183_s14 + $0x8] sm:$0xff]  ;;  %v237_v5 = vrot.slane %v216_v1, 1  ;;  %v240_v7 = vrot.slane %v218_v0, 1  ;;  %v267_v12 = vrot.slane %v216_v1, 7  ;;  %v270_v18 = vrot.slane %v218_v0, 7 }
  0x60   : > { %v1444_v4 = vld [vmem:[%s174_s16 + $0x8] sm:$0xff]  ;;  %v241_v6 = vrot.slane %v219_v2, 1  ;;  %v238_v8 = vrot.slane %v217_v3, 1  ;;  %v1447_v10 = vld [vmem:[%s174_s16] sm:$0xff]  ;;  %v1449_v11 = vld [vmem:[%s174_s16 + $0x18] sm:$0xff]  ;;  %v268_v13 = vrot.slane %v217_v3, 7 }
  0x61   : > { %v221_v9 = vsub.f32 %v1444_v4, %v217_v3  ;;  %v220_v14 = vsub.f32 %v1447_v10, %v216_v1  ;;  %v223_v16 = vsub.f32 %v1449_v11, %v219_v2  ;;  %v1454_v17 = vld [vmem:[%s174_s16 + $0x10] sm:$0xff]  ;;  %v277_v34 = vsel %vm266_vm1, 0.0, %v267_v12  ;;  %s1233_s5 = smov 1   ;;  %s925_s19 = sshll.u32 %s1290_s0, 1 }
  0x62   : > { %v248_v15 = vsel %vm236_vm0, %v241_v6, 0.0  ;;  %v247_v19 = vsel %vm236_vm0, %v238_v8, 0.0  ;;  %v239_v20 = vsel %vm236_vm0, %v237_v5, %v238_v8  ;;  %v242_v22 = vsel %vm236_vm0, %v240_v7, %v241_v6  ;;  %s748_s26 = sld [smem:[#allocation4 + %s925_s19]]  ;;  %s773_s29 = sadd.s32 1, %s925_s19 }
  0x63   : > { %v252_v21 = vsub.f32 %v1449_v11, %v248_v15  ;;  %302 = vrot.lane.b32.xlu1 %v219_v2, %s1232_s18  ;;  %298 = vrot.lane.b32.xlu0 %v217_v3, %s1232_s18  ;;  %v1462_v23 = vand.u32 2147483647, %v221_v9  ;;  %v250_v24 = vsub.f32 %v1444_v4, %v247_v19  ;;  %v1465_v25 = vand.u32 2147483647, %v220_v14  ;;  %s774_s13 = sld [smem:[#allocation4 + %s773_s29]]  ;;  %s924_s9 = sshll.u32 %s1429_s15, 1 }
  0x64   : > { %v249_v26 = vsub.f32 %v1447_v10, %v239_v20  ;;  %v1468_v27 = vand.u32 2147483647, %v223_v16  ;;  %v222_v28 = vsub.f32 %v1454_v17, %v218_v0  ;;  %v251_v29 = vsub.f32 %v1454_v17, %v242_v22  ;;  %s208_s12 = scalar_lea.vmem [#allocation10], %s924_s9  ;;  %s940_s20 = sshll.u32 %s1290_s0, 5 }
  0x65   : > { %v269_v30 = vsel %vm266_vm1, %v267_v12, %v268_v13  ;;  %v1473_v31 = vand.u32 2147483647, %v250_v24  ;;  %v1479_v35 = vand.u32 2147483647, %v252_v21  ;;  %v279_v38 = vsub.f32 %v1447_v10, %v277_v34  ;;  %s814_s10 = sshll.u32 %s208_s12, 4  ;;  %s1759_s17 = scalar_lea.hbm %s1807_s3, %s940_s20  ;;  %s1754_s10 = int_to_ptr.vmem [resolvable:$true] %s814_s10 }
  0x66   : > { %v1475_v32 = vand.u32 2147483647, %v249_v26  ;;  %v280_v33 = vsub.f32 %v1444_v4, %v269_v30  ;;  %v1481_v36 = vand.u32 2147483647, %v222_v28  ;;  %v1483_v37 = vand.u32 2147483647, %v251_v29 }
  0x67   : > { %332 = vrot.lane.b32.xlu1 %v217_v3, %s1233_s5  ;;  %330 = vrot.lane.b32.xlu0 %v216_v1, %s1233_s5  ;;  %v263_v39 = vmin.f32 %v1462_v23, %v1473_v31  ;;  %v271_v42 = vrot.slane %v219_v2, 7  ;;  %v1494_v43 = vand.u32 2147483647, %v279_v38  ;;  %v278_v44 = vsel %vm266_vm1, 0.0, %v270_v18  ;;  %s801_s16 = scalar_lea.sflag [#allocation7], %s1429_s15  ;;  %s1153_s8 = scalar_lea.vmem %s1754_s10, 32 }
  0x68   : > { %v262_v40 = vmin.f32 %v1465_v25, %v1475_v32  ;;  %v1492_v41 = vand.u32 2147483647, %v280_v33  ;;  %v264_v45 = vmin.f32 %v1481_v36, %v1483_v37  ;;  %v281_v47 = vsub.f32 %v1454_v17, %v278_v44  ;;  %p1154_p2 = scmp.ne.s32.totalorder %s1754_s10, %s1153_s8  ;;  %p1817_p4 = scmp.ne.s32.totalorder %s1812_s6, 0 }
  0x69   : > { %v272_v46 = vsel %vm266_vm1, %v270_v18, %v271_v42  ;;  %v265_v49 = vmin.f32 %v1468_v27, %v1479_v35  ;;  %vm308_vm2 = vcmask 1039360   ;;  %vm342_vm3 = vcmask 7168   ;;  %s1235_s0 = smov [#allocation10]  }
  0x6a   : > { %v1502_v48 = vmin.f32 %v263_v39, %v1492_v41  ;;  %v282_v50 = vsub.f32 %v1449_v11, %v272_v46  ;;  %v1508_v51 = vmin.f32 %v262_v40, %v1494_v43  ;;  %v1512_v52 = vand.u32 2147483647, %v281_v47  ;;  %p1155_p1 = pnand %p1154_p2, %p1817_p4  ;;  %s1157_s14 = sshll.u32 %s1235_s0, 4  ;;  %s1158_s14 = int_to_ptr.vmem [resolvable:$false] %s1157_s14 }
  0x6b   : > { %336 = vrot.lane.b32.xlu1 %v219_v2, %s1233_s5  ;;  %334 = vrot.lane.b32.xlu0 %v218_v0, %s1233_s5  ;;  %p1160_p8 = scmp.lt.s32.totalorder %s1754_s10, %s1158_s14 }
  0x6c   : > { %v1514_v53 = vand.u32 2147483647, %v282_v50  ;;  %v1517_v54 = vmin.f32 %v264_v45, %v1512_v52  ;;  %p1156_p13 = pneg %p1155_p1 }
  0x6e   : > { %v1520_v55 = vmin.f32 %v265_v49, %v1514_v53 }
  0x6f   : > { %368 = vrot.lane.b32.xlu1 %v247_v19, %s1232_s18  ;;  %366 = vrot.lane.b32.xlu0 %v239_v20, %s1232_s18 }
  0x73   : > { %372 = vrot.lane.b32.xlu1 %v248_v15, %s1232_s18  ;;  %370 = vrot.lane.b32.xlu0 %v242_v22, %s1232_s18 }
  0x77   : > { %403 = vrot.lane.b32.xlu1 %v269_v30, %s1233_s5  ;;  %401 = vrot.lane.b32.xlu0 %v277_v34, %s1233_s5 }
  0x7b   : > { %407 = vrot.lane.b32.xlu1 %v272_v46, %s1233_s5  ;;  %405 = vrot.lane.b32.xlu0 %v278_v44, %s1233_s5 }
  0x7f   : > { %436 = vrot.lane.b32.xlu1 %v247_v19, %s1233_s5  ;;  %434 = vrot.lane.b32.xlu0 %v239_v20, %s1233_s5 }
  0x83   : > { %440 = vrot.lane.b32.xlu1 %v248_v15, %s1233_s5  ;;  %438 = vrot.lane.b32.xlu0 %v242_v22, %s1233_s5 }
  0x87   : > { %469 = vrot.lane.b32.xlu1 %v269_v30, %s1232_s18  ;;  %467 = vrot.lane.b32.xlu0 %v277_v34, %s1232_s18 }
  0x8b   : > { %473 = vrot.lane.b32.xlu1 %v272_v46, %s1232_s18  ;;  %471 = vrot.lane.b32.xlu0 %v278_v44, %s1232_s18  ;;  %s1159_s18 = scalar_lea.vmem %s1158_s14, 64 }
  0x8c   : > { %p1161_p10 = scmp.lt.s32.totalorder %s1159_s18, %s1153_s8 }
  0x8e   : > { %p1162_p12 = por %p1161_p10, %p1160_p8 }
  0x90   : > { %p1163_p0 = pnand %p1162_p12, %p1156_p13 }
  0xd1   : > { %v301_v56 = vpop.permute.xlu1 %300  ;;  %v297_v57 = vpop.permute.xlu0 %296 }
  0xd2   : > { %v311_v2 = vsel %vm308_vm2, %v301_v56, 0.0  ;;  %v309_v3 = vsel %vm308_vm2, %v297_v57, 0.0 }
  0xd3   : > { %v315_v8 = vsub.f32 %v1454_v17, %v311_v2  ;;  %v313_v9 = vsub.f32 %v1447_v10, %v309_v3 }
  0xd5   : > { %v303_v58 = vpop.permute.xlu1 %302  ;;  %v299_v59 = vpop.permute.xlu0 %298  ;;  %v1545_v16 = vand.u32 2147483647, %v315_v8  ;;  %v1549_v20 = vand.u32 2147483647, %v313_v9 }
  0xd6   : > { %v310_v5 = vsel %vm308_vm2, %v299_v59, 0.0  ;;  %v312_v13 = vsel %vm308_vm2, %v303_v58, 0.0 }
  0xd7   : > { %v314_v12 = vsub.f32 %v1444_v4, %v310_v5  ;;  %v316_v21 = vsub.f32 %v1449_v11, %v312_v13  ;;  %v328_v38 = vmin.f32 %v1517_v54, %v1545_v16  ;;  %v326_v40 = vmin.f32 %v1508_v51, %v1549_v20 }
  0xd9   : > { %v333_v60 = vpop.permute.xlu1 %332  ;;  %v331_v61 = vpop.permute.xlu0 %330  ;;  %v1552_v22 = vand.u32 2147483647, %v314_v12  ;;  %v1567_v46 = vand.u32 2147483647, %v316_v21 }
  0xda   : > { %v344_v18 = vsel %vm342_vm3, 0.0, %v333_v60  ;;  %v343_v19 = vsel %vm342_vm3, 0.0, %v331_v61 }
  0xdb   : > { %v348_v28 = vsub.f32 %v1444_v4, %v344_v18  ;;  %v347_v29 = vsub.f32 %v1447_v10, %v343_v19  ;;  %v327_v47 = vmin.f32 %v1502_v48, %v1552_v22  ;;  %v329_v3 = vmin.f32 %v1520_v55, %v1567_v46 }
  0xdd   : > { %v337_v62 = vpop.permute.xlu1 %336  ;;  %v335_v63 = vpop.permute.xlu0 %334  ;;  %v1573_v54 = vand.u32 2147483647, %v348_v28  ;;  %v1575_v56 = vand.u32 2147483647, %v347_v29 }
  0xde   : > { %v345_v24 = vsel %vm342_vm3, 0.0, %v335_v63  ;;  %v346_v39 = vsel %vm342_vm3, 0.0, %v337_v62 }
  0xdf   : > { %v349_v42 = vsub.f32 %v1454_v17, %v345_v24  ;;  %v350_v51 = vsub.f32 %v1449_v11, %v346_v39  ;;  %v361_v8 = vmin.f32 %v327_v47, %v1573_v54  ;;  %v360_v18 = vmin.f32 %v326_v40, %v1575_v56 }
  0xe1   : > { %v369_v0 = vpop.permute.xlu1 %368  ;;  %v367_v1 = vpop.permute.xlu0 %366  ;;  %v1583_v63 = vand.u32 2147483647, %v349_v42  ;;  %v1604_v24 = vand.u32 2147483647, %v350_v51 }
  0xe2   : > { %v379_v26 = vsel %vm308_vm2, %v369_v0, 0.0  ;;  %v378_v30 = vsel %vm308_vm2, %v367_v1, 0.0 }
  0xe3   : > { %v383_v44 = vsub.f32 %v1444_v4, %v379_v26  ;;  %v382_v49 = vsub.f32 %v1447_v10, %v378_v30  ;;  %v362_v26 = vmin.f32 %v328_v38, %v1583_v63 }
  0xe5   : > { %v373_v6 = vpop.permute.xlu1 %372  ;;  %v371_v7 = vpop.permute.xlu0 %370  ;;  %v1585_v0 = vand.u32 2147483647, %v383_v44  ;;  %v1591_v5 = vand.u32 2147483647, %v382_v49 }
  0xe6   : > { %v380_v57 = vsel %vm308_vm2, %v371_v7, 0.0  ;;  %v381_v60 = vsel %vm308_vm2, %v373_v6, 0.0 }
  0xe7   : > { %v384_v6 = vsub.f32 %v1454_v17, %v380_v57  ;;  %v385_v9 = vsub.f32 %v1449_v11, %v381_v60  ;;  %v396_v28 = vmin.f32 %v361_v8, %v1585_v0  ;;  %v395_v30 = vmin.f32 %v360_v18, %v1591_v5 }
  0xe9   : > { %v404_v14 = vpop.permute.xlu1 %403  ;;  %v402_v15 = vpop.permute.xlu0 %401  ;;  %v1616_v40 = vand.u32 2147483647, %v385_v9 }
  0xea   : > { %v414_v45 = vsel %vm342_vm3, 0.0, %v404_v14  ;;  %v413_v50 = vsel %vm342_vm3, 0.0, %v402_v15 }
  0xeb   : > { %v418_v61 = vsub.f32 %v1444_v4, %v414_v45  ;;  %v417_v1 = vsub.f32 %v1447_v10, %v413_v50 }
  0xed   : > { %v408_v33 = vpop.permute.xlu1 %407  ;;  %v406_v34 = vpop.permute.xlu0 %405  ;;  %v1600_v19 = vand.u32 2147483647, %v418_v61  ;;  %v1608_v29 = vand.u32 2147483647, %v417_v1 }
  0xee   : > { %v415_v2 = vsel %vm342_vm3, 0.0, %v406_v34  ;;  %v416_v12 = vsel %vm342_vm3, 0.0, %v408_v33  ;;  %v1611_v33 = vand.u32 2147483647, %v384_v6 }
  0xef   : > { %v419_v55 = vsub.f32 %v1454_v17, %v415_v2  ;;  %v420_v34 = vsub.f32 %v1449_v11, %v416_v12  ;;  %v431_v49 = vmin.f32 %v396_v28, %v1600_v19 }
  0xf1   : > { %v437_v58 = vpop.permute.xlu1 %436  ;;  %v435_v59 = vpop.permute.xlu0 %434  ;;  %v1623_v50 = vand.u32 2147483647, %v419_v55 }
  0xf2   : > { %v447_v48 = vsel %vm342_vm3, 0.0, %v437_v58  ;;  %v446_v62 = vsel %vm342_vm3, 0.0, %v435_v59  ;;  %v363_v58 = vmin.f32 %v329_v3, %v1604_v24  ;;  %v430_v59 = vmin.f32 %v395_v30, %v1608_v29 }
  0xf3   : > { %v451_v7 = vsub.f32 %v1444_v4, %v447_v48  ;;  %v450_v13 = vsub.f32 %v1447_v10, %v446_v62  ;;  %v397_v48 = vmin.f32 %v362_v26, %v1611_v33  ;;  %v1632_v62 = vand.u32 2147483647, %v420_v34 }
  0xf5   : > { %v441_v14 = vpop.permute.xlu1 %440  ;;  %v439_v15 = vpop.permute.xlu0 %438  ;;  %v1614_v39 = vand.u32 2147483647, %v451_v7  ;;  %v1618_v42 = vand.u32 2147483647, %v450_v13 }
  0xf6   : > { %v448_v21 = vsel %vm342_vm3, 0.0, %v439_v15  ;;  %v449_v44 = vsel %vm342_vm3, 0.0, %v441_v14 }
  0xf7   : > { %v452_v38 = vsub.f32 %v1454_v17, %v448_v21  ;;  %v464_v1 = vmin.f32 %v431_v49, %v1614_v39  ;;  %v453_v2 = vsub.f32 %v1449_v11, %v449_v44  ;;  %v463_v6 = vmin.f32 %v430_v59, %v1618_v42 }
  0xf9   : > { %v470_v45 = vpop.permute.xlu1 %469  ;;  %v468_v47 = vpop.permute.xlu0 %467  ;;  %v1637_v7 = vand.u32 2147483647, %v452_v38  ;;  %v1650_v28 = vand.u32 2147483647, %v453_v2 }
  0xfa   : > { %v480_v51 = vsel %vm308_vm2, %v470_v45, 0.0  ;;  %v479_v57 = vsel %vm308_vm2, %v468_v47, 0.0 }
  0xfb   : > { %v484_v60 = vsub.f32 %v1444_v4, %v480_v51  ;;  %v483_v61 = vsub.f32 %v1447_v10, %v479_v57  ;;  %v398_v4 = vmin.f32 %v363_v58, %v1616_v40  ;;  %v432_v10 = vmin.f32 %v397_v48, %v1623_v50 }
  0xfd   : > { %v488_v8 = vand.u32 2147483647, %v484_v60  ;;  %v487_v3 = vand.u32 2147483647, %v483_v61  ;;  %v474_v9 = vpop.permute.xlu1 %473  ;;  %v472_v12 = vpop.permute.xlu0 %471  ;;  %v433_v26 = vmin.f32 %v398_v4, %v1632_v62  ;;  %v465_v30 = vmin.f32 %v432_v10, %v1637_v7 }
  0xfe   : > { %v482_v13 = vsel %vm308_vm2, %v474_v9, 0.0  ;;  %v481_v14 = vsel %vm308_vm2, %v472_v12, 0.0 }
  0xff   : > { %v1643_v15 = vmin.f32 %v464_v1, %v488_v8  ;;  %v1645_v18 = vmin.f32 %v463_v6, %v487_v3  ;;  %v486_v55 = vsub.f32 %v1449_v11, %v482_v13  ;;  %v485_v21 = vsub.f32 %v1454_v17, %v481_v14 }
 0x100   : > { %v466_v61 = vmin.f32 %v433_v26, %v1650_v28 }
 0x101   : > { %v693_v34 = vsub.f32 %v488_v8, %v1643_v15  ;;  %v692_v44 = vsub.f32 %v487_v3, %v1645_v18  ;;  %v489_v38 = vand.u32 2147483647, %v485_v21  ;;  %v505_v45 = vsub.f32 %v1462_v23, %v1643_v15 }
 0x102   : > { %v525_v47 = vsub.f32 %v1473_v31, %v1643_v15  ;;  %v549_v11 = vsub.f32 %v1492_v41, %v1643_v15  ;;  %v573_v17 = vsub.f32 %v1552_v22, %v1643_v15  ;;  %v1663_v57 = vand.u32 2147483647, %v486_v55 }
 0x103   : > { %v697_v49 = vmul.f32 -32.0, %v693_v34  ;;  %v696_v51 = vmul.f32 -32.0, %v692_v44  ;;  %v1665_v58 = vmin.f32 %v465_v30, %v489_v38  ;;  %v509_v59 = vmul.f32 -32.0, %v505_v45 }
 0x104   : > { %v529_v60 = vmul.f32 -32.0, %v525_v47  ;;  %v553_v31 = vmul.f32 -32.0, %v549_v11  ;;  %v577_v41 = vmul.f32 -32.0, %v573_v17  ;;  %v597_v22 = vsub.f32 %v1573_v54, %v1643_v15 }
 0x105   : > { %v702_v48 = vmul.f32 1.442695, %v697_v49  ;;  %v694_v1 = vsub.f32 %v489_v38, %v1665_v58  ;;  %v514_v2 = vmul.f32 1.442695, %v509_v59  ;;  %v700_v8 = vmul.f32 1.442695, %v696_v51 }
 0x106   : > { %v534_v6 = vmul.f32 1.442695, %v529_v60  ;;  %v1672_v3 = vmin.f32 %v466_v61, %v1663_v57  ;;  %v601_v9 = vmul.f32 -32.0, %v597_v22  ;;  %v621_v12 = vsub.f32 %v1585_v0, %v1643_v15 }
 0x107   : > { %1003 = vpow2.f32 %v702_v48  ;;  %v645_v4 = vsub.f32 %v1600_v19, %v1643_v15  ;;  %v1678_v10 = vmul.f32 -32.0, %v694_v1  ;;  %v558_v13 = vmul.f32 1.442695, %v553_v31 }
 0x108   : > { %1005 = vpow2.f32 %v514_v2  ;;  %v669_v14 = vsub.f32 %v1614_v39, %v1643_v15  ;;  %v582_v54 = vmul.f32 1.442695, %v577_v41  ;;  %v625_v55 = vmul.f32 -32.0, %v621_v12 }
 0x109   : > { %1007 = vpow2.f32 %v534_v6  ;;  %v649_v21 = vmul.f32 -32.0, %v645_v4  ;;  %v606_v26 = vmul.f32 1.442695, %v601_v9  ;;  %v504_v34 = vsub.f32 %v1465_v25, %v1645_v18 }
 0x10a   : > { %v673_v30 = vmul.f32 -32.0, %v669_v14  ;;  %v524_v0 = vsub.f32 %v1475_v32, %v1645_v18  ;;  %1009 = vpow2.f32 %v700_v8  ;;  %v630_v19 = vmul.f32 1.442695, %v625_v55 }
 0x10b   : > { %v654_v44 = vmul.f32 1.442695, %v649_v21  ;;  %v548_v38 = vsub.f32 %v1494_v43, %v1645_v18  ;;  %1011 = vpow2.f32 %v558_v13  ;;  %v508_v45 = vmul.f32 -32.0, %v504_v34 }
 0x10c   : > { %v678_v39 = vmul.f32 1.442695, %v673_v30  ;;  %v528_v47 = vmul.f32 -32.0, %v524_v0  ;;  %1013 = vpow2.f32 %v582_v54  ;;  %v572_v17 = vsub.f32 %v1549_v20, %v1645_v18 }
 0x10d   : > { %v552_v11 = vmul.f32 -32.0, %v548_v38  ;;  %v596_v49 = vsub.f32 %v1575_v56, %v1645_v18  ;;  %1015 = vpow2.f32 %v606_v26  ;;  %v512_v32 = vmul.f32 1.442695, %v508_v45 }
 0x10e   : > { %v532_v51 = vmul.f32 1.442695, %v528_v47  ;;  %v620_v59 = vsub.f32 %v1591_v5, %v1645_v18  ;;  %1017 = vpow2.f32 %v630_v19  ;;  %v576_v60 = vmul.f32 -32.0, %v572_v17 }
 0x10f   : > { %v556_v43 = vmul.f32 1.442695, %v552_v11  ;;  %v600_v61 = vmul.f32 -32.0, %v596_v49  ;;  %1019 = vpow2.f32 %v654_v44  ;;  %v644_v1 = vsub.f32 %v1608_v29, %v1645_v18 }
 0x110   : > { %v624_v48 = vmul.f32 -32.0, %v620_v59  ;;  %v668_v20 = vsub.f32 %v1618_v42, %v1645_v18  ;;  %1021 = vpow2.f32 %v678_v39  ;;  %v580_v56 = vmul.f32 1.442695, %v576_v60 }
 0x111   : > { %v1698_v31 = vpop.eup %1003  ;;  %v604_v2 = vmul.f32 1.442695, %v600_v61  ;;  %v506_v5 = vsub.f32 %v1481_v36, %v1665_v58  ;;  %1023 = vpow2.f32 %v512_v32  ;;  %v648_v22 = vmul.f32 -32.0, %v644_v1 }
 0x112   : > { %v1006_v6 = vpop.eup %1005  ;;  %v628_v41 = vmul.f32 1.442695, %v624_v48  ;;  %v672_v8 = vmul.f32 -32.0, %v668_v20  ;;  %1025 = vpow2.f32 %v532_v51  ;;  %v526_v29 = vsub.f32 %v1483_v37, %v1665_v58 }
 0x113   : > { %v1008_v9 = vpop.eup %1007  ;;  %v510_v12 = vmul.f32 -32.0, %v506_v5  ;;  %v550_v42 = vsub.f32 %v1512_v52, %v1665_v58  ;;  %1027 = vpow2.f32 %v556_v43  ;;  %v652_v13 = vmul.f32 1.442695, %v648_v22 }
 0x114   : > { %v541_v4 = vadd.f32 %v1008_v9, %v1006_v6  ;;  %v676_v14 = vmul.f32 1.442695, %v672_v8  ;;  %v1706_v54 = vpop.eup %1009  ;;  %1029 = vpow2.f32 %v580_v56  ;;  %v530_v21 = vmul.f32 -32.0, %v526_v29 }
 0x115   : > { %v516_v55 = vmul.f32 1.442695, %v510_v12  ;;  %v554_v26 = vmul.f32 -32.0, %v550_v42  ;;  %v1012_v30 = vpop.eup %1011  ;;  %1031 = vpow2.f32 %v604_v2  ;;  %v574_v34 = vsub.f32 %v1545_v16, %v1665_v58 }
 0x116   : > { %v598_v37 = vsub.f32 %v1583_v63, %v1665_v58  ;;  %v622_v52 = vsub.f32 %v1611_v33, %v1665_v58  ;;  %v1014_v0 = vpop.eup %1013  ;;  %v565_v19 = vadd.f32 %v1012_v30, %v541_v4  ;;  %1033 = vpow2.f32 %v628_v41 }
 0x117   : > { %v536_v44 = vmul.f32 1.442695, %v530_v21  ;;  %v560_v38 = vmul.f32 1.442695, %v554_v26  ;;  %v1016_v39 = vpop.eup %1015  ;;  %1035 = vpow2.f32 %v652_v13  ;;  %v578_v45 = vmul.f32 -32.0, %v574_v34 }
 0x118   : > { %v602_v47 = vmul.f32 -32.0, %v598_v37  ;;  %v626_v11 = vmul.f32 -32.0, %v622_v52  ;;  %v1018_v17 = vpop.eup %1017  ;;  %v589_v49 = vadd.f32 %v1014_v0, %v565_v19  ;;  %1037 = vpow2.f32 %v676_v14 }
 0x119   : > { %v646_v16 = vsub.f32 %v1623_v50, %v1665_v58  ;;  %v670_v63 = vsub.f32 %v1637_v7, %v1665_v58  ;;  %v1020_v33 = vpop.eup %1019  ;;  %1039 = vpow2.f32 %v516_v55  ;;  %v584_v32 = vmul.f32 1.442695, %v578_v45 }
 0x11a   : > { %v608_v51 = vmul.f32 1.442695, %v602_v47  ;;  %v632_v59 = vmul.f32 1.442695, %v626_v11  ;;  %v1022_v43 = vpop.eup %1021  ;;  %v613_v60 = vadd.f32 %v1016_v39, %v589_v49  ;;  %1041 = vpow2.f32 %v536_v44 }
 0x11b   : > { %v650_v61 = vmul.f32 -32.0, %v646_v16  ;;  %v674_v48 = vmul.f32 -32.0, %v670_v63  ;;  %v1024_v1 = vpop.eup %1023  ;;  %1043 = vpow2.f32 %v560_v38  ;;  %v507_v20 = vsub.f32 %v1468_v27, %v1672_v3 }
 0x11c   : > { %v527_v50 = vsub.f32 %v1479_v35, %v1672_v3  ;;  %v551_v7 = vsub.f32 %v1514_v53, %v1672_v3  ;;  %v1026_v56 = vpop.eup %1025  ;;  %v704_v2 = vmul.f32 1.442695, %v1678_v10  ;;  %v637_v5 = vadd.f32 %v1018_v17, %v613_v60 }
 0x11d   : > { %1045 = vpow2.f32 %v584_v32  ;;  %v656_v6 = vmul.f32 1.442695, %v650_v61  ;;  %v1028_v41 = vpop.eup %1027  ;;  %v540_v22 = vadd.f32 %v1026_v56, %v1024_v1  ;;  %v680_v8 = vmul.f32 1.442695, %v674_v48 }
 0x11e   : > { %v511_v9 = vmul.f32 -32.0, %v507_v20  ;;  %v531_v12 = vmul.f32 -32.0, %v527_v50  ;;  %v1030_v29 = vpop.eup %1029  ;;  %v661_v42 = vadd.f32 %v1020_v33, %v637_v5  ;;  %1047 = vpow2.f32 %v608_v51 }
 0x11f   : > { %v555_v4 = vmul.f32 -32.0, %v551_v7  ;;  %v575_v35 = vsub.f32 %v1567_v46, %v1672_v3  ;;  %v1032_v13 = vpop.eup %1031  ;;  %v564_v53 = vadd.f32 %v1028_v41, %v540_v22  ;;  %1049 = vpow2.f32 %v632_v59 }
 0x120   : > { %v518_v14 = vmul.f32 1.442695, %v511_v9  ;;  %v538_v10 = vmul.f32 1.442695, %v531_v12  ;;  %v1034_v55 = vpop.eup %1033  ;;  %v685_v21 = vadd.f32 %v1022_v43, %v661_v42  ;;  %1051 = vpow2.f32 %v656_v6 }
 0x121   : > { %v562_v26 = vmul.f32 1.442695, %v555_v4  ;;  %v579_v30 = vmul.f32 -32.0, %v575_v35  ;;  %v1036_v34 = vpop.eup %1035  ;;  %v588_v37 = vadd.f32 %v1030_v29, %v564_v53  ;;  %v599_v52 = vsub.f32 %v1604_v24, %v1672_v3 }
 0x122   : > { %1053 = vpow2.f32 %v518_v14  ;;  %v623_v0 = vsub.f32 %v1616_v40, %v1672_v3  ;;  %v1038_v46 = vpop.eup %1037  ;;  %v709_v19 = vadd.f32 %v1698_v31, %v685_v21  ;;  %v647_v38 = vsub.f32 %v1632_v62, %v1672_v3 }
 0x123   : > { %1055 = vpow2.f32 %v538_v10  ;;  %v586_v44 = vmul.f32 1.442695, %v579_v30  ;;  %v1040_v39 = vpop.eup %1039  ;;  %v612_v45 = vadd.f32 %v1032_v13, %v588_v37  ;;  %v603_v47 = vmul.f32 -32.0, %v599_v52 }
 0x124   : > { %1057 = vpow2.f32 %v562_v26  ;;  %v627_v11 = vmul.f32 -32.0, %v623_v0  ;;  %v1042_v17 = vpop.eup %1041  ;;  %v695_v24 = vsub.f32 %v1663_v57, %v1672_v3  ;;  %v651_v49 = vmul.f32 -32.0, %v647_v38 }
 0x125   : > { %1059 = vlog2.f32 %v709_v19  ;;  %v671_v40 = vsub.f32 %v1650_v28, %v1672_v3  ;;  %v1044_v31 = vpop.eup %1043  ;;  %v636_v16 = vadd.f32 %v1034_v55, %v612_v45  ;;  %v542_v63 = vadd.f32 %v1042_v17, %v1040_v39 }
 0x126   : > { %1061 = vpow2.f32 %v680_v8  ;;  %v610_v33 = vmul.f32 1.442695, %v603_v47  ;;  %v634_v32 = vmul.f32 1.442695, %v627_v11  ;;  %v699_v61 = vmul.f32 -32.0, %v695_v24 }
 0x127   : > { %v1046_v62 = vpop.eup %1045  ;;  %1063 = vpow2.f32 %v586_v44  ;;  %v675_v51 = vmul.f32 -32.0, %v671_v40  ;;  %v660_v59 = vadd.f32 %v1036_v34, %v636_v16  ;;  %v566_v43 = vadd.f32 %v1044_v31, %v542_v63 }
 0x128   : > { %1065 = vpow2.f32 %v704_v2  ;;  %v1048_v60 = vpop.eup %1047  ;;  %v658_v57 = vmul.f32 1.442695, %v651_v49  ;;  %v706_v41 = vmul.f32 1.442695, %v699_v61  ;;  %v749_v61 = vstv %s748_s26 }
 0x129   : > { %1067 = vpow2.f32 %v610_v33  ;;  %v1050_v48 = vpop.eup %1049  ;;  %v684_v1 = vadd.f32 %v1038_v46, %v660_v59  ;;  %v590_v20 = vadd.f32 %v1046_v62, %v566_v43  ;;  %v682_v50 = vmul.f32 1.442695, %v675_v51 }
 0x12a   : > { %v1052_v28 = vpop.eup %1051  ;;  %1069 = vpow2.f32 %v634_v32  ;;  %v744_v59 = vlaneseq }
 0x12b   : > { %v708_v56 = vadd.f32 %v1706_v54, %v684_v1  ;;  %v614_v5 = vadd.f32 %v1048_v60, %v590_v20  ;;  %1071 = vpow2.f32 %v658_v57 }
 0x12c   : > { %v1054_v7 = vpop.eup %1053  ;;  %v745_v43 = vshrl.u32 %v744_v59, 7 }
 0x12d   : > { %v1056_v6 = vpop.eup %1055  ;;  %1073 = vlog2.f32 %v708_v56  ;;  %v638_v22 = vadd.f32 %v1050_v48, %v614_v5 }
 0x12e   : > { %v1058_v2 = vpop.eup %1057  ;;  %v543_v8 = vadd.f32 %v1056_v6, %v1054_v7  ;;  %1075 = vpow2.f32 %v682_v50  ;;  %v746_v60 = vadd.s32 8, %v745_v43  ;;  %vm750_vm5 = vcmp.lt.s32.totalorder %v745_v43, %v749_v61 }
 0x12f   : > { %v1060_v9 = vpop.eup %1059  ;;  %v662_v42 = vadd.f32 %v1052_v28, %v638_v22  ;;  %1077 = vpow2.f32 %v706_v41  ;;  %v775_v7 = vstv %s774_s13 }
 0x130   : > { %v1062_v12 = vpop.eup %1061  ;;  %v715_v29 = vmul.f32 0.6931472, %v1060_v9  ;;  %v567_v4 = vadd.f32 %v1058_v2, %v543_v8  ;;  %vm751_vm4 = vcmp.lt.s32.totalorder %v746_v60, %v749_v61  ;;  %vm776_vm6 = vcmp.lt.s32.totalorder %v745_v43, %v775_v7 }
 0x131   : > { %v1064_v35 = vpop.eup %1063  ;;  %v686_v14 = vadd.f32 %v1062_v12, %v662_v42  ;;  %vm777_vm7 = vcmp.lt.s32.totalorder %v746_v60, %v775_v7 }
 0x132   : > { %v1066_v13 = vpop.eup %1065  ;;  %v721_v53 = vmul.f32 0.03125, %v715_v29  ;;  %v591_v54 = vadd.f32 %v1064_v35, %v567_v4 }
 0x133   : > { %v1068_v10 = vpop.eup %1067  ;;  %v710_v21 = vadd.f32 %v1066_v13, %v686_v14 }
 0x134   : > { %v725_v55 = vsub.f32 %v1643_v15, %v721_v53  ;;  %v615_v26 = vadd.f32 %v1068_v10, %v591_v54  ;;  %v1070_v30 = vpop.eup %1069 }
 0x135   : > { %1079 = vlog2.f32 %v710_v21  ;;  %v1072_v52 = vpop.eup %1071 }
 0x136   : > { %v729_v34 = vadd.f32 %v725_v55, %v1462_v23  ;;  %v639_v37 = vadd.f32 %v1070_v30, %v615_v26 }
 0x137   : > { %v1074_v0 = vpop.eup %1073 }
 0x138   : > { %v733_v46 = vmul.f32 0.5, %v729_v34  ;;  %v663_v19 = vadd.f32 %v1072_v52, %v639_v37  ;;  %v1076_v44 = vpop.eup %1075  ;;  %v713_v38 = vmul.f32 0.6931472, %v1074_v0 }
 0x139   : > { %v1078_v45 = vpop.eup %1077 }
 0x13a   : > { %738 = vadd.xlane.f32.xlu1 %v733_v46  ;;  %v687_v39 = vadd.f32 %v1076_v44, %v663_v19  ;;  %v720_v47 = vmul.f32 0.03125, %v713_v38 }
 0x13c   : > { %v711_v11 = vadd.f32 %v1078_v45, %v687_v39  ;;  %v724_v15 = vsub.f32 %v1645_v18, %v720_v47 }
 0x13e   : > { %1081 = vlog2.f32 %v711_v11  ;;  %v728_v17 = vadd.f32 %v724_v15, %v1465_v25 }
 0x13f   : > { %v1080_v24 = vpop.eup %1079 }
 0x140   : > { %v732_v23 = vmul.f32 0.5, %v728_v17  ;;  %v717_v49 = vmul.f32 0.6931472, %v1080_v24 }
 0x142   : > { %736 = vadd.xlane.f32.xlu0 %v732_v23  ;;  %v722_v40 = vmul.f32 0.03125, %v717_v49 }
 0x144   : > { %v726_v31 = vsub.f32 %v1665_v58, %v722_v40  ;;  %v1234_v58 = vmov 0.0  }
 0x145   : > { %v926_v1 = vsel %vm750_vm5, 1.0, %v1234_v58  ;;  %v928_v5 = vsel %vm776_vm6, 1.0, %v1234_v58  ;;  %v929_v6 = vsel %vm777_vm7, 1.0, %v1234_v58 }
 0x146   : > { %v730_v16 = vadd.f32 %v726_v31, %v1481_v36  ;;  %v927_v36 = vsel %vm751_vm4, 1.0, %v1234_v58 }
 0x148   : > { %v1082_v63 = vpop.eup %1081  ;;  %v734_v33 = vmul.f32 0.5, %v730_v16 }
 0x149   : > { %v719_v62 = vmul.f32 0.6931472, %v1082_v63 }
 0x14a   : > { %740 = vadd.xlane.f32.xlu0 %v734_v33 }
 0x14b   : > { %v723_v32 = vmul.f32 0.03125, %v719_v62 }
 0x14d   : > { %v727_v18 = vsub.f32 %v1672_v3, %v723_v32 }
 0x14f   : > { %v731_v51 = vadd.f32 %v727_v18, %v1468_v27 }
 0x151   : > { %v735_v25 = vmul.f32 0.5, %v731_v51 }
 0x153   : > { %742 = vadd.xlane.f32.xlu0 %v735_v25 }
 0x1c7   : > { %v739_v57 = vpop.xlane.xlu1 %738 }
 0x1c8   : > { %v757_v48 = vmul.f32 %v927_v36, %v739_v57 }
 0x1ca   : > { %v759_v27 = vsel %vm342_vm3, %v757_v48, 0.0 }
 0x1cf   : > { %v737_v3 = vpop.xlane.xlu0 %736 }
 0x1d0   : > { %v756_v20 = vmul.f32 %v926_v1, %v737_v3 }
 0x1d2   : > { %v758_v28 = vsel %vm342_vm3, %v756_v20, 0.0 }
 0x1d3   : > { %v760_v50 = vadd.f32 %v759_v27, %v758_v28 }
 0x1d5   : > { %761 = vadd.xlane.f32.xlu1 %v760_v50 }
 0x1d7   : > { %v741_v56 = vpop.xlane.xlu0 %740 }
 0x1d8   : > { %v782_v41 = vmul.f32 %v928_v5, %v741_v56 }
 0x1da   : > { %v784_v8 = vsel %vm342_vm3, %v782_v41, 0.0 }
 0x1e0   : > { %v743_v2 = vpop.xlane.xlu0 %742 }
 0x1e1   : > { %v783_v22 = vmul.f32 %v929_v6, %v743_v2 }
 0x1e3   : > { %v785_v9 = vsel %vm342_vm3, %v783_v22, 0.0 }
 0x1e4   : > { %v786_v12 = vadd.f32 %v785_v9, %v784_v8 }
 0x1e6   : > { %787 = vadd.xlane.f32.xlu0 %v786_v12 }
 0x262   : > { %v762_v29 = vpop.xlane.xlu1 %761 }
 0x263   : > { %v763_v42 = vrot.slane %v762_v29, 4 }
 0x265   : > { %v764_v4 = vadd.f32 %v763_v42, %v762_v29 }
 0x267   : > { %v765_v35 = vrot.slane %v764_v4, 2 }
 0x269   : > { %v766_v13 = vadd.f32 %v765_v35, %v764_v4 }
 0x26b   : > { %v767_v53 = vrot.slane %v766_v13, 1 }
 0x26d   : > { %v768_v14 = vadd.f32 %v767_v53, %v766_v13 }
 0x26f   : > { %941 = vpush %v768_v14 }
 0x273   : > { %v788_v54 = vpop.xlane.xlu0 %787 }
 0x274   : > { %v789_v10 = vrot.slane %v788_v54, 4 }
 0x276   : > { %v790_v55 = vadd.f32 %v789_v10, %v788_v54 }
 0x278   : > { %v791_v21 = vrot.slane %v790_v55, 2 }
 0x27a   : > { %v792_v26 = vadd.f32 %v791_v21, %v790_v55 }
 0x27c   : > { %v793_v30 = vrot.slane %v792_v26, 1 }
 0x27e   : > { %v794_v34 = vadd.f32 %v793_v30, %v792_v26 }
 0x280   : > { %943 = vpush %v794_v34 }
 0x2a0   : > { %s942_s11 = spop %941 }
 0x2a1   : > { %v770_v37 = vstv %s942_s11 }
 0x2a2   : > { %772 = vst [vmem:[%s208_s12] sm:$0x1] %v770_v37 }
 0x2b1   : > { %s944_s4 = spop %943 }
 0x2b2   : > { %v796_v52 = vstv %s944_s4 }
 0x2b3   : > { %930 = vst [vmem:[%s208_s12 + $0x1] sm:$0x1] %v796_v52 }
 0x2b4   : > { %1166 = shalt.err (!%p1163_p0)
}
 0x2b5   : > { %s1167_s19 = scalar_lea.hbm %s1759_s17, 32  ;;  %s1171_s13 = scalar_lea.hbm %s1807_s3, 64 }
 0x2b6   : > { %p1168_p6 = scmp.ne.s32.totalorder %s1759_s17, %s1167_s19  ;;  %p1172_p5 = scmp.lt.u32.totalorder %s1759_s17, %s1807_s3 }
 0x2b7   : > { %p1173_p7 = scmp.lt.u32.totalorder %s1171_s13, %s1167_s19  ;;  %p1175_p2 = scmp.lt.u32.totalorder %s1167_s19, %s1759_s17 }
 0x2b8   : > { %p1169_p11 = pnand %p1168_p6, %p1817_p4 }
 0x2b9   : > { %p1174_p9 = por %p1173_p7, %p1172_p5 }
 0x2ba   : > { %p1170_p3 = pneg %p1169_p11 }
 0x2bb   : > { %p1176_p1 = por %p1175_p2, %p1174_p9 }
 0x2bd   : > { %p1177_p13 = pnand %p1176_p1, %p1170_p3 }
 0x2bf   : > { %1180 = shalt.err (!%p1177_p13)
}
 0x2c0   : > { %s1236_s12 = smov 16  }
 0x2c1   : > { %949 = dma.vmem_to_hbm [thread:$0]  (%p1817_p4), %s1754_s10, 32, %s1759_s17, %s801_s16, %s1236_s12, %s1236_s12, %s1233_s5  }
 0x2c2 PF: > { %s829_s20 = sand.u32 1, %s1213_s22   ;;  %p1818_p8 = scmp.ne.s32.totalorder %s1813_s7, 0 }
 0x2c3   : > { %p1819_p10 = scmp.ge.s32.totalorder %s1225_s25, 2  ;;  %s830_s21 = scalar_lea.sflag [#allocation7], %s829_s20 }
 0x2c5   : > { %p959_p12 = pnand %p1819_p10, %p1818_p8 }
 0x2c7   : > { %1208 = dma.done.wait (!%p959_p12), %s830_s21, 32  }
 0x2c8   : > { %1210 = vsyncadd (!%p959_p12), %s830_s21, 4294967264  ;;  %p23_p0 = scmp.ge.s32.totalorder %s1294_s27, 4   ;;  %s1820_s22 = smov %s1217_s23 }
 0x2c9   : > { %s1821_s23 = smov %s1221_s24  ;;  %s1822_s24 = smov %s1306_s30 }
 0x2ca   : > { %s1823_s25 = smov %s1294_s27  ;;  %25 = sbr.rel (!%p23_p0) target bundleno = 19 (0x13), region = 95 }
 0x2d1   :  { %835 = vsyncpa [#allocation6], 1 }
 0x2d2   :  { %837 = vsyncpa [#allocation6 + $0x1], 1 }
 0x2d3   :  { %838 = vsyncpa [#allocation9], 1 }
 0x2d4   :  { %840 = vsyncpa [#allocation9 + $0x1], 1 }
 0x2d5   :  { %841 = vsyncpa [#allocation7], 1 }
 0x2d6   :  { %843 = vsyncpa [#allocation7 + $0x1], 1 }

</bundles_post_ra>
